<compile_context>
chip_gen: v5e
topology: v5e:2x2
jax: 0.10.0
libtpu: 0.0.40
codegen_flags: <defaults>
</compile_context>

<pallas_src>
import jax
import jax.numpy as jnp
import numpy as np
from jax.experimental import pallas as pl
from jax.experimental.pallas import tpu as pltpu


# ----------------------------------------------------------------------------
# Kernel: one batch tile (block_b sequences) per grid step.
# ----------------------------------------------------------------------------
def _head_kernel(x_ref, wqkv_ref, bqkv_ref, mask_ref, w0_ref, b0_ref, o_ref):
    Bt, S, Dm = x_ref.shape
    d_pad = wqkv_ref.shape[1] // 3

    # ---- fused, lane-aligned Q/K/V projection (bf16 MXU, f32 accumulate) ----
    x = x_ref[...].reshape(Bt * S, Dm).astype(jnp.bfloat16)
    qkv = jnp.dot(x, wqkv_ref[...], preferred_element_type=jnp.float32)
    qkv = (qkv + bqkv_ref[...]).reshape(Bt, S, 3 * d_pad)
    # Each section is padded to a multiple of 128 lanes -> vreg-aligned slices.
    q = qkv[:, :, 0 * d_pad:1 * d_pad].astype(jnp.bfloat16)   # 1/sqrt(d_k) pre-folded
    k = qkv[:, :, 1 * d_pad:2 * d_pad].astype(jnp.bfloat16)
    v = qkv[:, :, 2 * d_pad:3 * d_pad].astype(jnp.bfloat16)

    # ---- causal attention ----------------------------------------------------
    w = jnp.einsum('bqd,bkd->bqk', q, k, preferred_element_type=jnp.float32)
    w = w + mask_ref[...]                       # additive causal bias (0 / -1e30)
    w = w - jnp.max(w, axis=-1, keepdims=True)
    e = jnp.exp(w)
    inv = pl.reciprocal(jnp.sum(e, axis=-1, keepdims=True), approx=True)
    p = (e * inv).astype(jnp.bfloat16)          # bf16 operand for the PV matmul
    a = jnp.einsum('bqk,bkd->bqd', p, v, preferred_element_type=jnp.float32)

    # ---- output projection (compact d_out; masked vst fine at tiny widths) ---
    a2 = a.reshape(Bt * S, d_pad).astype(jnp.bfloat16)
    out = jnp.dot(a2, w0_ref[...], preferred_element_type=jnp.float32)
    out = out + b0_ref[...]
    o_ref[...] = out.reshape(Bt, S, -1).astype(o_ref.dtype)


# ----------------------------------------------------------------------------
# Host-side parameter preparation (fusion / lane padding / dtype).
# Weights are stored as [in, out] (transposed vs torch.nn.Linear's [out, in]);
# biases are 1-D and get reshaped to (1, n) here.
# ----------------------------------------------------------------------------
def prepare_head_params(wq, bq, wk, bk, wv, bv, w0, b0):
    d_model, d_internal = wq.shape
    d_out = w0.shape[1]
    d_pad = ((d_internal + 127) // 128) * 128           # lane-aligned section width
    scale = float(d_internal) ** -0.5                   # d_k ** -0.5 folded into Q

    def pad_w(w):
        return jnp.zeros((d_model, d_pad), jnp.float32).at[:, :d_internal].set(w)

    def pad_b(b):
        return jnp.zeros((d_pad,), jnp.float32).at[:d_internal].set(b)

    w_qkv = jnp.concatenate(
        [pad_w(wq * scale), pad_w(wk), pad_w(wv)], axis=1).astype(jnp.bfloat16)
    b_qkv = jnp.concatenate(
        [pad_b(bq * scale), pad_b(bk), pad_b(bv)]).reshape(1, -1).astype(jnp.float32)
    w0p = (jnp.zeros((d_pad, d_out), jnp.float32)
           .at[:d_internal, :].set(w0)).astype(jnp.bfloat16)
    b0p = jnp.asarray(b0, jnp.float32).reshape(1, -1)
    return (w_qkv, b_qkv, w0p, b0p), d_out


def make_causal_bias(seq_length, neg=-1e30):
    """Additive causal bias: 0 on/below the diagonal, large-negative above."""
    row = jnp.arange(seq_length)[:, None]
    col = jnp.arange(seq_length)[None, :]
    return jnp.where(col <= row, 0.0, neg).astype(jnp.float32)


def _vmem_estimate_bytes(block_b, S, Dm, d_pad, d_out):
    """Rough per-step VMEM footprint (double-buffered x/out + intermediates)."""
    f32 = 4
    x_tiles = 2 * block_b * S * Dm * 2          # bf16 x, double-buffered
    out_tiles = 2 * block_b * S * d_out * f32   # f32 out, double-buffered
    qkv = block_b * S * 3 * d_pad * f32
    scores = 3 * block_b * S * S * f32          # w / e / p live ranges
    attn = block_b * S * d_pad * f32
    return x_tiles + out_tiles + qkv + scores + attn


# ----------------------------------------------------------------------------
# Wrapper: grid over batch tiles.
# ----------------------------------------------------------------------------
def head_forward(x, fused_params, causal_bias, d_out, *, block_b=None,
                 vmem_budget_bytes=40 * 1024 * 1024):
    w_qkv, b_qkv, w0p, b0p = fused_params
    B, S, Dm = x.shape
    three_dp = w_qkv.shape[1]
    d_pad = three_dp // 3

    if block_b is None:
        # >= 2 batch tiles so both v7x TensorCores get work (and smaller
        # per-step VMEM footprint under its 64 MiB physical ceiling).
        block_b = B // 2 if (B >= 2 and B % 2 == 0) else B
    # Shrink block_b until it divides B and the per-step footprint fits.
    while block_b > 1 and (
            B % block_b != 0
            or _vmem_estimate_bytes(block_b, S, Dm, d_pad, d_out) > vmem_budget_bytes):
        block_b -= 1
    assert B % block_b == 0
    grid = (B // block_b,)

    x_bf16 = x.astype(jnp.bfloat16)             # halve the x-tile DMA bytes

    out = pl.pallas_call(
        _head_kernel,
        out_shape=jax.ShapeDtypeStruct((B, S, d_out), jnp.float32),
        grid=grid,
        in_specs=[
            pl.BlockSpec((block_b, S, Dm), lambda b: (b, 0, 0)),
            pl.BlockSpec((Dm, three_dp), lambda b: (0, 0)),
            pl.BlockSpec((1, three_dp), lambda b: (0, 0)),
            pl.BlockSpec((S, S), lambda b: (0, 0)),
            pl.BlockSpec((d_pad, d_out), lambda b: (0, 0)),
            pl.BlockSpec((1, d_out), lambda b: (0, 0)),
        ],
        out_specs=pl.BlockSpec((block_b, S, d_out), lambda b: (b, 0, 0)),
        compiler_params=pltpu.CompilerParams(
            dimension_semantics=("parallel",)),
    )(x_bf16, w_qkv, b_qkv, causal_bias, w0p, b0p)
    return out


# ----------------------------------------------------------------------------
# Pure-JAX f32 reference of the torch module (unfused math, for correctness).
# ----------------------------------------------------------------------------
def head_reference(x, wq, bq, wk, bk, wv, bv, w0, b0):
    q = x @ wq + bq
    k = x @ wk + bk
    v = x @ wv + bv
    d_k = k.shape[-1]
    w = jnp.einsum('bqd,bkd->bqk', q, k) * (float(d_k) ** -0.5)
    S = x.shape[1]
    tril = jnp.tril(jnp.ones((S, S), bool))
    w = jnp.where(tril[None], w, -jnp.inf)
    p = jax.nn.softmax(w, axis=-1)
    a = jnp.einsum('bqk,bkd->bqd', p, v)
    return a @ w0 + b0


if __name__ == "__main__":
    # Shapes consistent with Head(seq_length, d_model, num_heads, d_internal)
    seq_length, d_model, num_heads, d_internal = 8, 32, 4, 16
    d_out = d_model // num_heads          # w0: d_internal -> d_model // num_heads
    B = 2

    key = jax.random.PRNGKey(0)
    ks = jax.random.split(key, 9)
    x = jax.random.normal(ks[0], (B, seq_length, d_model), dtype=jnp.float32)
    # weights stored as [in, out] (transposed relative to torch nn.Linear)
    wq = 0.05 * jax.random.normal(ks[1], (d_model, d_internal), jnp.float32)
    bq = 0.05 * jax.random.normal(ks[2], (d_internal,), jnp.float32)
    wk = 0.05 * jax.random.normal(ks[3], (d_model, d_internal), jnp.float32)
    bk = 0.05 * jax.random.normal(ks[4], (d_internal,), jnp.float32)
    wv = 0.05 * jax.random.normal(ks[5], (d_model, d_internal), jnp.float32)
    bv = 0.05 * jax.random.normal(ks[6], (d_internal,), jnp.float32)
    w0 = 0.05 * jax.random.normal(ks[7], (d_internal, d_out), jnp.float32)
    b0 = 0.05 * jax.random.normal(ks[8], (d_out,), jnp.float32)

    fused, d_out_real = prepare_head_params(wq, bq, wk, bk, wv, bv, w0, b0)
    causal_bias = make_causal_bias(seq_length)

    out = head_forward(x, fused, causal_bias, d_out_real)
    out = jax.block_until_ready(out)

    ref = head_reference(x, wq, bq, wk, bk, wv, bv, w0, b0)
    ref = jax.block_until_ready(ref)

    assert out.shape == (B, seq_length, d_out)
    # bf16 MXU operands + approx reciprocal -> relaxed tolerance vs f32 reference.
    np.testing.assert_allclose(np.asarray(out), np.asarray(ref),
                               rtol=5e-2, atol=1e-2)
    print("KERNEL_OK")
</pallas_src>

<mosaic_0001>
module attributes {stable_mosaic.version = 11 : i64} {
  func.func @_head_kernel(%arg0: i32, %arg1: memref<1x8x32xbf16, #tpu.memory_space<vmem>>, %arg2: memref<32x384xbf16, #tpu.memory_space<vmem>>, %arg3: memref<1x384xf32, #tpu.memory_space<vmem>>, %arg4: memref<8x8xf32, #tpu.memory_space<vmem>>, %arg5: memref<128x8xbf16, #tpu.memory_space<vmem>>, %arg6: memref<1x8xf32, #tpu.memory_space<vmem>>, %arg7: memref<1x8x8xf32, #tpu.memory_space<vmem>>) attributes {dimension_semantics = [#tpu.dimension_semantics<parallel>], iteration_bounds = array<i64: 2>, scalar_prefetch = 0 : i64, scratch_operands = 0 : i64, tpu.core_type = #tpu.core_type<tc>, window_params = [{transform_indices = @transform_0, window_bounds = array<i64: 1, 8, 32>}, {pipeline_mode = #tpu.pipeline_mode<synchronous>, transform_indices = @transform_1, window_bounds = array<i64: 32, 384>}, {pipeline_mode = #tpu.pipeline_mode<synchronous>, transform_indices = @transform_2, window_bounds = array<i64: 1, 384>}, {pipeline_mode = #tpu.pipeline_mode<synchronous>, transform_indices = @transform_3, window_bounds = array<i64: 8, 8>}, {pipeline_mode = #tpu.pipeline_mode<synchronous>, transform_indices = @transform_4, window_bounds = array<i64: 128, 8>}, {pipeline_mode = #tpu.pipeline_mode<synchronous>, transform_indices = @transform_5, window_bounds = array<i64: 1, 8>}, {transform_indices = @transform_6, window_bounds = array<i64: 1, 8, 8>}]} {
    %c0 = arith.constant 0 : index
    %c0_0 = arith.constant 0 : index
    %c0_1 = arith.constant 0 : index
    %0 = vector.load %arg1[%c0, %c0_0, %c0_1] : memref<1x8x32xbf16, #tpu.memory_space<vmem>>, vector<1x8x32xbf16>
    %1 = vector.shape_cast %0 : vector<1x8x32xbf16> to vector<8x32xbf16>
    %c0_2 = arith.constant 0 : index
    %c0_3 = arith.constant 0 : index
    %2 = vector.load %arg2[%c0_2, %c0_3] : memref<32x384xbf16, #tpu.memory_space<vmem>>, vector<32x384xbf16>
    %cst = arith.constant dense<0.000000e+00> : vector<8x384xf32>
    %3 = tpu.matmul %1, %2, %cst {dimension_numbers = #tpu.dot_dimension_numbers<[1], [0], [0], [1], [0, 0, 1, 1], [], []>} : vector<8x32xbf16>, vector<32x384xbf16>, vector<8x384xf32> -> vector<8x384xf32>
    %c0_4 = arith.constant 0 : index
    %c0_5 = arith.constant 0 : index
    %4 = vector.load %arg3[%c0_4, %c0_5] : memref<1x384xf32, #tpu.memory_space<vmem>>, vector<1x384xf32>
    %5 = vector.broadcast %4 : vector<1x384xf32> to vector<8x384xf32>
    %6 = arith.addf %3, %5 : vector<8x384xf32>
    %7 = vector.shape_cast %6 : vector<8x384xf32> to vector<1x8x384xf32>
    %8 = vector.extract_strided_slice %7 {offsets = [0, 0, 0], sizes = [1, 8, 128], strides = [1, 1, 1]} : vector<1x8x384xf32> to vector<1x8x128xf32>
    %9 = arith.truncf %8 : vector<1x8x128xf32> to vector<1x8x128xbf16>
    %10 = vector.extract_strided_slice %7 {offsets = [0, 0, 128], sizes = [1, 8, 128], strides = [1, 1, 1]} : vector<1x8x384xf32> to vector<1x8x128xf32>
    %11 = arith.truncf %10 : vector<1x8x128xf32> to vector<1x8x128xbf16>
    %12 = vector.extract_strided_slice %7 {offsets = [0, 0, 256], sizes = [1, 8, 128], strides = [1, 1, 1]} : vector<1x8x384xf32> to vector<1x8x128xf32>
    %13 = arith.truncf %12 : vector<1x8x128xf32> to vector<1x8x128xbf16>
    "tpu.trace_start"() <{level = 10 : i32, message = "bqd,bkd->bqk"}> : () -> ()
    %cst_6 = arith.constant dense<0.000000e+00> : vector<1x8x8xf32>
    %14 = tpu.matmul %9, %11, %cst_6 {dimension_numbers = #tpu.dot_dimension_numbers<[2], [2], [1], [1], [0, 0, 0, 1, 1, 1], [0], [0]>} : vector<1x8x128xbf16>, vector<1x8x128xbf16>, vector<1x8x8xf32> -> vector<1x8x8xf32>
    "tpu.trace_stop"() : () -> ()
    %c0_7 = arith.constant 0 : index
    %c0_8 = arith.constant 0 : index
    %15 = vector.load %arg4[%c0_7, %c0_8] : memref<8x8xf32, #tpu.memory_space<vmem>>, vector<8x8xf32>
    %16 = vector.shape_cast %15 : vector<8x8xf32> to vector<1x8x8xf32>
    %17 = arith.addf %14, %16 : vector<1x8x8xf32>
    %cst_9 = arith.constant dense<0xFF800000> : vector<1x8xf32>
    %18 = vector.multi_reduction <maximumf>, %17, %cst_9 [2] : vector<1x8x8xf32> to vector<1x8xf32>
    %19 = vector.shape_cast %18 : vector<1x8xf32> to vector<1x8x1xf32>
    %20 = vector.broadcast %19 : vector<1x8x1xf32> to vector<1x8x8xf32>
    %21 = arith.subf %17, %20 : vector<1x8x8xf32>
    %22 = math.exp %21 : vector<1x8x8xf32>
    %cst_10 = arith.constant dense<0.000000e+00> : vector<1x8xf32>
    %23 = vector.multi_reduction <add>, %22, %cst_10 [2] : vector<1x8x8xf32> to vector<1x8xf32>
    %24 = vector.shape_cast %23 : vector<1x8xf32> to vector<1x8x1xf32>
    %25 = tpu.reciprocal %24 {approx = true} : vector<1x8x1xf32> -> vector<1x8x1xf32>
    %26 = vector.broadcast %25 : vector<1x8x1xf32> to vector<1x8x8xf32>
    %27 = arith.mulf %22, %26 : vector<1x8x8xf32>
    %28 = arith.truncf %27 : vector<1x8x8xf32> to vector<1x8x8xbf16>
    "tpu.trace_start"() <{level = 10 : i32, message = "bqk,bkd->bqd"}> : () -> ()
    %cst_11 = arith.constant dense<0.000000e+00> : vector<1x8x128xf32>
    %29 = tpu.matmul %28, %13, %cst_11 {dimension_numbers = #tpu.dot_dimension_numbers<[2], [1], [1], [2], [0, 0, 0, 1, 1, 2], [0], [0]>} : vector<1x8x8xbf16>, vector<1x8x128xbf16>, vector<1x8x128xf32> -> vector<1x8x128xf32>
    "tpu.trace_stop"() : () -> ()
    %30 = vector.shape_cast %29 : vector<1x8x128xf32> to vector<8x128xf32>
    %31 = arith.truncf %30 : vector<8x128xf32> to vector<8x128xbf16>
    %c0_12 = arith.constant 0 : index
    %c0_13 = arith.constant 0 : index
    %32 = vector.load %arg5[%c0_12, %c0_13] : memref<128x8xbf16, #tpu.memory_space<vmem>>, vector<128x8xbf16>
    %cst_14 = arith.constant dense<0.000000e+00> : vector<8x8xf32>
    %33 = tpu.matmul %31, %32, %cst_14 {dimension_numbers = #tpu.dot_dimension_numbers<[1], [0], [0], [1], [0, 0, 1, 1], [], []>} : vector<8x128xbf16>, vector<128x8xbf16>, vector<8x8xf32> -> vector<8x8xf32>
    %c0_15 = arith.constant 0 : index
    %c0_16 = arith.constant 0 : index
    %34 = vector.load %arg6[%c0_15, %c0_16] : memref<1x8xf32, #tpu.memory_space<vmem>>, vector<1x8xf32>
    %35 = vector.broadcast %34 : vector<1x8xf32> to vector<8x8xf32>
    %36 = arith.addf %33, %35 : vector<8x8xf32>
    %37 = vector.shape_cast %36 : vector<8x8xf32> to vector<1x8x8xf32>
    %c0_17 = arith.constant 0 : index
    %c0_18 = arith.constant 0 : index
    %c0_19 = arith.constant 0 : index
    %38 = vector.load %arg7[%c0_17, %c0_18, %c0_19] : memref<1x8x8xf32, #tpu.memory_space<vmem>>, vector<1x8x8xf32>
    tpu.vector_store %arg7[%c0_17, %c0_18, %c0_19], %37 {strides = array<i32>} : memref<1x8x8xf32, #tpu.memory_space<vmem>>, vector<1x8x8xf32>,
    return
  }
  func.func @transform_0(%arg0: i32) -> (i32, i32, i32) {
    %c0_i32 = arith.constant 0 : i32
    %c0_i32_0 = arith.constant 0 : i32
    %c0_i32_1 = arith.constant 0 : i32
    return %arg0, %c0_i32, %c0_i32_0 : i32, i32, i32
  }
  func.func @transform_1(%arg0: i32) -> (i32, i32) {
    %c0_i32 = arith.constant 0 : i32
    %c0_i32_0 = arith.constant 0 : i32
    %c0_i32_1 = arith.constant 0 : i32
    return %c0_i32, %c0_i32_0 : i32, i32
  }
  func.func @transform_2(%arg0: i32) -> (i32, i32) {
    %c0_i32 = arith.constant 0 : i32
    %c0_i32_0 = arith.constant 0 : i32
    %c0_i32_1 = arith.constant 0 : i32
    return %c0_i32, %c0_i32_0 : i32, i32
  }
  func.func @transform_3(%arg0: i32) -> (i32, i32) {
    %c0_i32 = arith.constant 0 : i32
    %c0_i32_0 = arith.constant 0 : i32
    %c0_i32_1 = arith.constant 0 : i32
    return %c0_i32, %c0_i32_0 : i32, i32
  }
  func.func @transform_4(%arg0: i32) -> (i32, i32) {
    %c0_i32 = arith.constant 0 : i32
    %c0_i32_0 = arith.constant 0 : i32
    %c0_i32_1 = arith.constant 0 : i32
    return %c0_i32, %c0_i32_0 : i32, i32
  }
  func.func @transform_5(%arg0: i32) -> (i32, i32) {
    %c0_i32 = arith.constant 0 : i32
    %c0_i32_0 = arith.constant 0 : i32
    %c0_i32_1 = arith.constant 0 : i32
    return %c0_i32, %c0_i32_0 : i32, i32
  }
  func.func @transform_6(%arg0: i32) -> (i32, i32, i32) {
    %c0_i32 = arith.constant 0 : i32
    %c0_i32_0 = arith.constant 0 : i32
    %c0_i32_1 = arith.constant 0 : i32
    return %arg0, %c0_i32, %c0_i32_0 : i32, i32, i32
  }
}

</mosaic_0001>

<bundles_post_ra>
// kernel: tpu_custom_call.1
= control target key start
LH: loop header
LB: loop body
LE: loop exit
PB: predicated region body
PF: predicated region fallthrough
CT: control target
= control target key end

     0   :  { %11 = vsyncpa [#allocation3], 0  ;;  %s936_s0 = inlined_call_operand.vmem [shape: bf16[2,8,32], index: 0, kind: input, shape index: {}]   ;;  %s937_s1 = inlined_call_operand.vmem [shape: bf16[32,384], index: 1, kind: input, shape index: {}]   ;;  %s938_s2 = inlined_call_operand.vmem [shape: f32[1,384], index: 2, kind: input, shape index: {}]   ;;  %s939_s3 = inlined_call_operand.vmem [shape: f32[8,8], index: 3, kind: input, shape index: {}]   ;;  %s940_s4 = inlined_call_operand.vmem [shape: bf16[128,8], index: 4, kind: input, shape index: {}]   ;;  %s941_s5 = inlined_call_operand.vmem [shape: f32[1,8], index: 5, kind: input, shape index: {}]   ;;  %s942_s6 = inlined_call_operand.hbm [shape: f32[2,8,8], index: 6, kind: output, shape index: {}]  }
   0x1   :  { %13 = vsyncpa [#allocation3 + $0x1], 0  ;;  %s775_s21 = smov 0   ;;  %s777_s22 = smov 0  }
   0x2   :  { %s779_s23 = smov 0   ;;  %s781_s24 = smov 0  }
   0x3 LB: > { %s796_s25 = sadd.s32 4294967295, %s738_s24   ;;  %s548_s26 = sadd.s32 4294967294, %s738_s24   ;;  %s738_s24 = sphi %s781_s24, %s948_s24   ;;  %s734_s23 = sphi %s779_s23, %s947_s23   ;;  %s730_s22 = sphi %s777_s22, %s946_s22   ;;  %s726_s21 = sphi %s775_s21, %s945_s21  }
   0x4   : > { %s800_s27 = sadd.s32 1, %s738_s24   ;;  %s157_s28 = sadd.s32 1, %s734_s23 }
   0x5   : > { %s154_s29 = ssub.s32 %s738_s24, %s800_s27  ;;  %p167_p0 = scmp.ne.s32.totalorder %s734_s23, %s730_s22 }
   0x6   : > { %p155_p1 = scmp.eq.s32.totalorder %s154_s29, 0  ;;  %p168_p2 = scmp.eq.s32.totalorder %s796_s25, 1 }
   0x7   : > { %p173_p3 = scmp.ne.s32.totalorder %s730_s22, %s726_s21  ;;  %p174_p4 = scmp.eq.s32.totalorder %s548_s26, 1 }
   0x8   : > { %s811_s30 = scalar_select %p155_p1, %s734_s23, %s157_s28  }
   0x9   : > { %p813_p5 = por %p168_p2, %p167_p0  ;;  %p817_p6 = por %p174_p4, %p173_p3 }
   0xa   : > { %p551_p7 = scmp.ge.s32.totalorder %s738_s24, 1  ;;  %p214_p8 = scmp.lt.s32.totalorder %s738_s24, 3 }
   0xc   : > { %p215_p9 = pnand %p551_p7, %p214_p8 }
   0xd   : > { %p243_p10 = scmp.lt.s32.totalorder (!%p215_p9), %s796_s25, 1  ;;  %s240_s13 = sand.u32 (!%p215_p9), 1, %s730_s22  }
   0xe   : > { %218 = sbr.rel (%p215_p9) target bundleno = 824 (0x338), region = 44  ;;  %s552_s15 = sshll.u32 (!%p215_p9), %s240_s13, 3 }
   0xf   : > { %s242_s26 = scalar_lea.vmem (!%p215_p9), [#allocation2], %s552_s15 }
  0x10   : > { %s486_s28 = sshll.u32 (!%p215_p9), %s242_s26, 4  ;;  %s487_s28 = int_to_ptr.vmem [resolvable:$true] %s486_s28 }
  0x13   : > { %v621_v0 = vld [vmem:[%s937_s1 + $0x1c] sm:$0xf]  ;;  %v570_v1 = vld [vmem:[%s937_s1 + $0x24] sm:$0xf0]  ;;  %v618_v2 = vld [vmem:[%s937_s1 + $0x4] sm:$0xf] }
  0x14   : > { %v573_v3 = vor.u32 %v621_v0, %v570_v1  ;;  %v558_v4 = vld [vmem:[%s937_s1 + $0xc] sm:$0xf0]  ;;  %v568_v5 = vld [vmem:[%s937_s1 + $0x18] sm:$0xf]  ;;  %v622_v6 = vld [vmem:[%s937_s1 + $0x20] sm:$0xf0] }
  0x15   : > { %v569_v7 = vor.u32 %v622_v6, %v568_v5  ;;  %v556_v8 = vld [vmem:[%s937_s1] sm:$0xf]  ;;  %v619_v9 = vld [vmem:[%s937_s1 + $0x8] sm:$0xf0]  ;;  %v561_v10 = vor.u32 %v618_v2, %v558_v4  ;;  %s244_s10 = scalar_select %p243_p10, %s796_s25, 1  ;;  %vm297_vm0 = vcmask 261120  }
  0x16   : > { %320 = vmatpush.bf16.msra.mxu2 %v573_v3  ;;  %v557_v11 = vor.u32 %v619_v9, %v556_v8  ;;  %v257_v13 = vld [vmem:[%s938_s2] sm:$0x7]  ;;  %v623_v25 = vld [vmem:[%s937_s1 + $0x28] sm:$0xf0]  ;;  %v564_v26 = vld [vmem:[%s937_s1 + $0x8] sm:$0xf] }
  0x17   : > { %307 = vmatpush.bf16.msra.mxu0 %v569_v7  ;;  %s553_s11 = sshll.u32 %s244_s10, 2  ;;  %v260_v15 = vperm.slane %v257_v13, 1  ;;  %v259_v16 = vperm.slane %v257_v13, 0  ;;  %v576_v24 = vld [vmem:[%s937_s1 + $0x20] sm:$0xf]  ;;  %vm357_vm1 = vcmask 64512  }
  0x18   : > { %s246_s14 = scalar_lea.vmem %s936_s0, %s553_s11  ;;  %v577_v27 = vor.u32 %v623_v25, %v576_v24  ;;  %v620_v28 = vld [vmem:[%s937_s1 + $0x10] sm:$0xf0]  ;;  %v343_v30 = vld [vmem:[%s939_s3] sm:$0xff]  ;;  %v261_v35 = vperm.slane %v257_v13, 2  ;;  %vm373_vm2 = vcmask 1043456   ;;  %v631_v46 = vld [vmem:[%s940_s4 + $0x38] sm:$0xff] }
  0x19   : > { %v248_v12 = vld [vmem:[%s246_s14] sm:$0xf]  ;;  %v565_v29 = vor.u32 %v620_v28, %v564_v26  ;;  %459 = vmatpush.bf16.msra.mxu1 %v631_v46  ;;  %v630_v47 = vld [vmem:[%s940_s4 + $0x30] sm:$0xff]  ;;  %v629_v48 = vld [vmem:[%s940_s4 + $0x28] sm:$0xff]  ;;  %s615_s14 = sshll.u32 %s796_s25, 3  ;;  %s474_s25 = scalar_lea.sflag [#allocation3], %s240_s13 }
  0x1a   : > { %321 = vmatpush.bf16.msra.mxu2 %v561_v10  ;;  %v628_v49 = vld [vmem:[%s940_s4 + $0x20] sm:$0xff]  ;;  %v627_v50 = vld [vmem:[%s940_s4 + $0x18] sm:$0xff]  ;;  %v626_v51 = vld [vmem:[%s940_s4 + $0x10] sm:$0xff]  ;;  %s484_s18 = scalar_lea.hbm %s942_s6, %s615_s14  ;;  %s696_s14 = scalar_lea.hbm %s942_s6, 16 }
  0x1b   : > { %308 = vmatpush.bf16.msra.mxu0 %v557_v11  ;;  %v625_v53 = vld [vmem:[%s940_s4 + $0x8] sm:$0xff]  ;;  %v624_v57 = vld [vmem:[%s940_s4] sm:$0xff]  ;;  %s488_s29 = sshll.u32 %s484_s18, 4  ;;  %s489_s29 = int_to_ptr.hbm [resolvable:$true] %s488_s29 }
  0x1c   : > { %v671_v61 = vld [vmem:[%s941_s5] ss:$0 sm:$0xff]  ;;  %s690_s9 = sshra.s32 %s489_s29, 4  ;;  %s691_s9 = int_to_ptr.hbm [resolvable:$true] %s690_s9 }
  0x1d   : > { %579 = vmatmul.msk.bf16.vlgmr.msra.gmra.mxu2 %vm297_vm0, %v248_v12  ;;  %460 = vmatpush.bf16.msra.mxu1 %v630_v47  ;;  %s692_s10 = scalar_lea.hbm %s691_s9, 8  ;;  %p697_p0 = scmp.lt.s32.totalorder %s691_s9, %s942_s6 }
  0x1e   : > { %578 = vmatmul.msk.bf16.vlgmr.msra.gmra.mxu0 %vm297_vm0, %v248_v12  ;;  %333 = vmatpush.bf16.msrb.mxu2 %v577_v27  ;;  %p693_p11 = scmp.ne.s32.totalorder %s691_s9, %s692_s10  ;;  %p698_p1 = scmp.lt.s32.totalorder %s696_s14, %s692_s10 }
  0x20   : > { %p694_p12 = pnand %p693_p11, %p813_p5  ;;  %p699_p2 = por %p698_p1, %p697_p0 }
  0x21   : > { %461 = vmatpush.bf16.msra.mxu1 %v629_v48 }
  0x22   : > { %334 = vmatpush.bf16.msrb.mxu2 %v565_v29  ;;  %p695_p13 = pneg %p694_p12 }
  0x24   : > { %p700_p3 = pnand %p699_p2, %p695_p13 }
  0x25   : > { %462 = vmatpush.bf16.msra.mxu1 %v628_v49 }
  0x29   : > { %463 = vmatpush.bf16.msra.mxu1 %v627_v50 }
  0x2d   : > { %580 = vmatmul.msk.bf16.vlgmr.msrb.gmra.mxu2 %vm297_vm0, %v248_v12  ;;  %464 = vmatpush.bf16.msra.mxu1 %v626_v51 }
  0x31   : > { %465 = vmatpush.bf16.msra.mxu1 %v625_v53 }
  0x35   : > { %466 = vmatpush.bf16.msra.mxu1 %v624_v57 }
  0x9b   : > { %v310_v14 = vpop.f32.mrf.mxu0 }
  0x9c   : > { %v311_v21 = vadd.f32 %v310_v14, %v259_v16 }
  0x9e   : > { %v340_v22 = vpack.c.bf16 %v311_v21, %v311_v21 }
  0xa0   : > { %v323_v17 = vpop.f32.mrf.mxu2 }
  0xa1   : > { %v324_v18 = vadd.f32 %v323_v17, %v260_v15 }
  0xa3   : > { %v341_v19 = vpack.c.bf16 %v324_v18, %v324_v18  ;;  %v312_v20 = vpop.f32.mrf.mxu0 }
  0xa5   : > { %351 = vmatpush.bf16.xpose.msra.mxu3 %v341_v19 }
  0xa8   : > { %v325_v23 = vpop.f32.mrf.mxu2 }
  0xac   : > { %352 = vmatmul.bf16.vlgmr.msra.gmra.mxu3 %v340_v22 }
  0xb0   : > { %v336_v36 = vpop.f32.mrf.mxu2 }
  0xb1   : > { %v337_v37 = vadd.f32 %v336_v36, %v261_v35 }
  0xb3   : > { %v342_v40 = vpack.c.bf16 %v337_v37, %v337_v37 }
  0xb5   : > { %v375_v42 = vsel %vm373_vm2, %v342_v40, 0 }
  0xb6   : > { %384 = vmatpush.bf16.msrb.mxu0 %v375_v42 }
  0xb8   : > { %v338_v43 = vpop.f32.mrf.mxu2 }
 0x12f   : > { %v353_v31 = vpop.f32.mrf.mxu3 }
 0x130   : > { %v354_v32 = vadd.f32 %v353_v31, %v343_v30 }
 0x132   : > { %v358_v33 = vsel %vm357_vm1, %v354_v32, -inf }
 0x133   : > { %359 = vmax.xlane.f32.xlu0 %v358_v33 }
 0x137   : > { %v355_v34 = vpop.f32.mrf.mxu3 }
 0x1a6   : > { %v360_v38 = vpop.xlane.xlu0 %359 }
 0x1a7   : > { %v361_v39 = vsub.f32 %v354_v32, %v360_v38 }
 0x1a9   : > { %v362_v41 = vmul.f32 1.442695, %v361_v39 }
 0x1ab   : > { %672 = vpow2.f32 %v362_v41 }
 0x1b1   : > { %v673_v44 = vpop.eup %672 }
 0x1b2   : > { %v364_v45 = vsel %vm357_vm1, %v673_v44, 0.0 }
 0x1b3   : > { %365 = vadd.xlane.f32.xlu0 %v364_v45 }
 0x226   : > { %v366_v52 = vpop.xlane.xlu0 %365 }
 0x227   : > { %674 = vrcp.f32 %v366_v52 }
 0x22d   : > { %v675_v54 = vpop.eup %674 }
 0x22e   : > { %v368_v55 = vmul.f32 %v675_v54, %v673_v44 }
 0x230   : > { %v369_v56 = vpack.c.bf16 %v368_v55, %v368_v55 }
 0x232   : > { %581 = vmatmul.msk.bf16.vlgmr.msrb.gmra.mxu0 %vm357_vm1, %v369_v56 }
 0x2af   : > { %v386_v58 = vpop.f32.mrf.mxu0 }
 0x2b0   : > { %v390_v59 = vpack.c.bf16 %v386_v58, %v386_v58 }
 0x2b2   : > { %467 = vmatmul.bf16.vlgmr.msra.gmra.mxu1 %v390_v59 }
 0x2b7   : > { %v388_v60 = vpop.f32.mrf.mxu0 }
 0x32f   : > { %v468_v62 = vpop.f32.mrf.mxu1 }
 0x330   : > { %v469_v63 = vadd.f32 %v671_v61, %v468_v62 }
 0x332   : > { %472 = vst.msk [vmem:[%s242_s26] sm:$0xff] %vm357_vm1, %v469_v63 }
 0x333   : > { %703 = shalt.err (!%p700_p3)
}
 0x334   : > { %632 = dma.vmem_to_hbm [thread:$0]  (%p813_p5), %s487_s28, 128, %s489_s29, %s474_s25  }
 0x337   : > { %v470_v0 = vpop.f32.mrf.mxu1 }
 0x338 PF: > { %p638_p4 = scmp.ge.s32.totalorder %s738_s24, 2  ;;  %s500_s13 = sand.u32 1, %s726_s21  }
 0x339   : > { %s501_s17 = scalar_lea.sflag [#allocation3], %s500_s13 }
 0x33a   : > { %p635_p7 = pnand %p638_p4, %p817_p6 }
 0x33c   : > { %p636_p8 = pneg %p635_p7 }
 0x33e   : > { %721 = dma.done.wait (%p636_p8), %s501_s17, 128  }
 0x33f   : > { %723 = vsyncadd (%p636_p8), %s501_s17, 4294967168  ;;  %p16_p9 = scmp.ge.s32.totalorder %s800_s27, 4   ;;  %s945_s21 = smov %s730_s22 }
 0x340   : > { %s946_s22 = smov %s734_s23  ;;  %s947_s23 = smov %s811_s30 }
 0x341   : > { %s948_s24 = smov %s800_s27  ;;  %18 = sbr.rel (!%p16_p9) target bundleno = 3 (0x3), region = 79 }
 0x346   :  { %507 = vsyncpa [#allocation3], 1 }
 0x347   :  { %509 = vsyncpa [#allocation3 + $0x1], 1 }

</bundles_post_ra>
